<compile_context>
chip_gen: v6e
topology: v6e:2x2x1
jax: 0.10.0
libtpu: 0.0.40
codegen_flags: <defaults>
</compile_context>

<pallas_src>
import functools

import jax
import jax.numpy as jnp
from jax.experimental import pallas as pl
from jax.experimental.pallas import tpu as pltpu

LN_EPS = 1e-5


def _pick_tile(seq_len_padded, max_tile):
    """Largest multiple-of-8 divisor of seq_len_padded that is <= max_tile."""
    best = 8
    for t in range(8, min(seq_len_padded, max_tile) + 1, 8):
        if seq_len_padded % t == 0:
            best = t
    return best


def _layernorm_affine(emb_f32, gamma_ref, beta_ref, out_dtype, hidden):
    """One-pass LayerNorm (sum + sum-of-squares) + affine, f32 math."""
    inv_h = 1.0 / float(hidden)
    s1 = jnp.sum(emb_f32, axis=-1, keepdims=True)
    s2 = jnp.sum(emb_f32 * emb_f32, axis=-1, keepdims=True)
    mean = s1 * inv_h
    var = jnp.maximum(s2 * inv_h - mean * mean, 0.0)
    normed = (emb_f32 - mean) * jax.lax.rsqrt(var + LN_EPS)
    return (normed * gamma_ref[...] + beta_ref[...]).astype(out_dtype)


# ----------------------------------------------------------------------------
# Path 1: word table resident in VMEM — gather with dynamic vector loads.
# ----------------------------------------------------------------------------
def _emb_kernel_resident(ids_ref, word_ref, pos_ref, gamma_ref, beta_ref,
                         out_ref, gather_buf,
                         *, tile_m, tiles_per_seq, hidden, unroll):
    m = pl.program_id(0)
    base = m * tile_m
    seq_off = pl.multiple_of((m % tiles_per_seq) * tile_m, 8)

    def gather_row(j, carry):
        row = ids_ref[base + j]                           # scalar from SMEM
        gather_buf[pl.ds(j, 1), :] = word_ref[pl.ds(row, 1), :]
        return carry

    jax.lax.fori_loop(0, tile_m, gather_row, 0, unroll=unroll)

    emb = (gather_buf[...].astype(jnp.float32)
           + pos_ref[pl.ds(seq_off, tile_m), :].astype(jnp.float32))
    # dropout: identity in eval mode
    out_ref[...] = _layernorm_affine(emb, gamma_ref, beta_ref,
                                     out_ref.dtype, hidden)


# ----------------------------------------------------------------------------
# Path 2: word table in HBM — per-row DMA gather, double-buffered across steps.
# ----------------------------------------------------------------------------
def _emb_kernel_hbm(ids_ref, word_hbm, pos_ref, gamma_ref, beta_ref,
                    out_ref, gather_buf, sems,
                    *, tile_m, tiles_per_seq, n_tiles, ring, hidden, unroll):
    m = pl.program_id(0)
    slot = m % 2

    def row_copy(tile_idx, slot_idx, j):
        # Built identically for start and wait so descriptors always match.
        row = ids_ref[tile_idx * tile_m + j]
        return pltpu.make_async_copy(
            word_hbm.at[pl.ds(row, 1), :],
            gather_buf.at[slot_idx, pl.ds(j, 1), :],
            sems.at[slot_idx, j % ring],
        )

    def issue_tile(tile_idx, slot_idx):
        def body(j, carry):
            row_copy(tile_idx, slot_idx, j).start()
            return carry
        jax.lax.fori_loop(0, tile_m, body, 0, unroll=unroll)

    def wait_tile(tile_idx, slot_idx):
        def body(j, carry):
            row_copy(tile_idx, slot_idx, j).wait()
            return carry
        jax.lax.fori_loop(0, tile_m, body, 0, unroll=unroll)

    # Prologue: nobody has prefetched tile 0 yet.
    @pl.when(m == 0)
    def _():
        issue_tile(0, 0)

    # Prefetch next tile into the other slot BEFORE blocking on this one, so
    # the HBM gather latency overlaps this step's wait + LayerNorm compute.
    @pl.when(m + 1 < n_tiles)
    def _():
        issue_tile(m + 1, (m + 1) % 2)

    wait_tile(m, slot)

    seq_off = pl.multiple_of((m % tiles_per_seq) * tile_m, 8)
    emb = (gather_buf[slot].astype(jnp.float32)
           + pos_ref[pl.ds(seq_off, tile_m), :].astype(jnp.float32))
    # dropout: identity in eval mode
    out_ref[...] = _layernorm_affine(emb, gamma_ref, beta_ref,
                                     out_ref.dtype, hidden)


# ----------------------------------------------------------------------------
# Wrapper
# ----------------------------------------------------------------------------
def decoder_embeddings(ids, word_table, pos_table, gamma, beta, *,
                       max_tile_tokens=256,
                       vmem_table_budget_bytes=12 * 1024 * 1024,
                       force_hbm_gather=False):
    B, S = ids.shape
    V, H = word_table.shape
    P, _ = pos_table.shape
    if S > P:
        raise ValueError("sequence length exceeds max_position_embeddings")

    # Pad the sequence axis to a multiple of 8 so tile shapes satisfy the
    # (8, 128) BlockSpec constraint for any S; padded rows sliced away below.
    s_pad = ((S + 7) // 8) * 8
    ids_p = ids.astype(jnp.int32)
    if s_pad != S:
        ids_p = jnp.pad(ids_p, ((0, 0), (0, s_pad - S)))
    pos_p = pos_table
    if P < s_pad:
        pos_p = jnp.pad(pos_table, ((0, s_pad - P), (0, 0)))
    p_pad = pos_p.shape[0]

    tile_m = _pick_tile(s_pad, max_tile_tokens)
    tiles_per_seq = s_pad // tile_m
    n_tiles = (B * s_pad) // tile_m
    ring = min(tile_m, 8)
    unroll = min(tile_m, 8)

    ids_flat = ids_p.reshape(B * s_pad)
    gamma2d = gamma.reshape(1, H).astype(jnp.float32)
    beta2d = beta.reshape(1, H).astype(jnp.float32)

    out_dtype = word_table.dtype            # keep the model's native dtype
    word_bytes = V * H * word_table.dtype.itemsize
    pos_bytes = p_pad * H * pos_p.dtype.itemsize
    out_tile_bytes = tile_m * H * jnp.dtype(out_dtype).itemsize
    gather_bytes = tile_m * H * word_table.dtype.itemsize

    use_resident = (not force_hbm_gather) and (word_bytes <= vmem_table_budget_bytes)

    pos_spec = pl.BlockSpec((p_pad, H), lambda m, ids: (0, 0))     # resident
    gamma_spec = pl.BlockSpec((1, H), lambda m, ids: (0, 0))
    beta_spec = pl.BlockSpec((1, H), lambda m, ids: (0, 0))
    out_spec = pl.BlockSpec((tile_m, H), lambda m, ids: (m, 0))

    if use_resident:
        kernel = functools.partial(
            _emb_kernel_resident, tile_m=tile_m, tiles_per_seq=tiles_per_seq,
            hidden=H, unroll=unroll)
        word_spec = pl.BlockSpec((V, H), lambda m, ids: (0, 0))    # resident
        scratch = [pltpu.VMEM((tile_m, H), word_table.dtype)]
        semantics = ("parallel",)   # no cross-step state -> megacore/2-TC ok
        needed = 2 * word_bytes + 2 * pos_bytes + 2 * out_tile_bytes + gather_bytes
    else:
        kernel = functools.partial(
            _emb_kernel_hbm, tile_m=tile_m, tiles_per_seq=tiles_per_seq,
            n_tiles=n_tiles, ring=ring, hidden=H, unroll=unroll)
        word_spec = pl.BlockSpec(memory_space=pl.ANY)              # stays in HBM
        scratch = [pltpu.VMEM((2, tile_m, H), word_table.dtype),
                   pltpu.SemaphoreType.DMA((2, ring))]
        semantics = ("arbitrary",)  # cross-step double-buffer -> sequential grid
        needed = 2 * pos_bytes + 2 * out_tile_bytes + 2 * gather_bytes

    vmem_limit = int(max(32 << 20, needed + (8 << 20)))

    out2d = pl.pallas_call(
        kernel,
        out_shape=jax.ShapeDtypeStruct((B * s_pad, H), out_dtype),
        grid_spec=pltpu.PrefetchScalarGridSpec(
            num_scalar_prefetch=1,
            grid=(n_tiles,),
            in_specs=[word_spec, pos_spec, gamma_spec, beta_spec],
            out_specs=out_spec,
            scratch_shapes=scratch,
        ),
        compiler_params=pltpu.CompilerParams(
            dimension_semantics=semantics,
            vmem_limit_bytes=vmem_limit,
        ),
    )(ids_flat, word_table, pos_p, gamma2d, beta2d)

    return out2d.reshape(B, s_pad, H)[:, :S, :]


def reference(ids, word_table, pos_table, gamma, beta):
    # pure-JAX reference mirroring the PyTorch forward (eval mode)
    S = ids.shape[1]
    emb = word_table[ids] + pos_table[jnp.arange(S)][None]
    mean = emb.mean(-1, keepdims=True)
    var = ((emb - mean) ** 2).mean(-1, keepdims=True)
    return (emb - mean) / jnp.sqrt(var + LN_EPS) * gamma + beta


if __name__ == "__main__":
    # Module config (small, consistent with DecoderEmbeddings.__init__)
    vocab_size = 32
    hidden_dim = 32
    pad_token_id = 0
    max_position_embeddings = 16
    # dropout = 0.1  (identity in eval mode)
    B, S = 2, 8

    key = jax.random.PRNGKey(0)
    k_ids, k_word, k_pos, k_g, k_b = jax.random.split(key, 5)

    ids = jax.random.randint(k_ids, (B, S), 0, vocab_size, dtype=jnp.int32)
    word_table = jax.random.normal(k_word, (vocab_size, hidden_dim), jnp.float32)
    word_table = word_table.at[pad_token_id].set(0.0)       # padding_idx row
    pos_table = jax.random.normal(k_pos, (max_position_embeddings, hidden_dim),
                                  jnp.float32)
    # LayerNorm affine params (defaults are 1/0; perturb to exercise the math)
    gamma = 1.0 + 0.1 * jax.random.normal(k_g, (hidden_dim,), jnp.float32)
    beta = 0.1 * jax.random.normal(k_b, (hidden_dim,), jnp.float32)

    ref = reference(ids, word_table, pos_table, gamma, beta)

    # Path 1: VMEM-resident word table (default for small vocabs).
    out_res = decoder_embeddings(ids, word_table, pos_table, gamma, beta)
    out_res = jax.block_until_ready(out_res)
    assert out_res.shape == (B, S, hidden_dim)
    assert jnp.allclose(out_res, ref, atol=1e-4, rtol=1e-4), "resident path mismatch"

    # Path 2: HBM table + double-buffered DMA row gather (forced for testing).
    out_hbm = decoder_embeddings(ids, word_table, pos_table, gamma, beta,
                                 force_hbm_gather=True)
    out_hbm = jax.block_until_ready(out_hbm)
    assert jnp.allclose(out_hbm, ref, atol=1e-4, rtol=1e-4), "hbm path mismatch"

    print("KERNEL_OK")
</pallas_src>

<mosaic_0001>
module attributes {stable_mosaic.version = 11 : i64} {
  func.func @_emb_kernel_resident(%arg0: i32, %arg1: memref<16xi32, #tpu.memory_space<smem>>, %arg2: memref<32x32xf32, #tpu.memory_space<vmem>>, %arg3: memref<16x32xf32, #tpu.memory_space<vmem>>, %arg4: memref<1x32xf32, #tpu.memory_space<vmem>>, %arg5: memref<1x32xf32, #tpu.memory_space<vmem>>, %arg6: memref<8x32xf32, #tpu.memory_space<vmem>>, %arg7: memref<8x32xf32, #tpu.memory_space<vmem>>) attributes {dimension_semantics = [#tpu.dimension_semantics<parallel>], iteration_bounds = array<i64: 2>, scalar_prefetch = 1 : i64, scratch_operands = 1 : i64, tpu.core_type = #tpu.core_type<tc>, window_params = [{pipeline_mode = #tpu.pipeline_mode<synchronous>, transform_indices = @transform_0, window_bounds = array<i64: 32, 32>}, {pipeline_mode = #tpu.pipeline_mode<synchronous>, transform_indices = @transform_1, window_bounds = array<i64: 16, 32>}, {pipeline_mode = #tpu.pipeline_mode<synchronous>, transform_indices = @transform_2, window_bounds = array<i64: 1, 32>}, {pipeline_mode = #tpu.pipeline_mode<synchronous>, transform_indices = @transform_3, window_bounds = array<i64: 1, 32>}, {transform_indices = @transform_4, window_bounds = array<i64: 8, 32>}]} {
    %c8_i32 = arith.constant 8 : i32
    %0 = arith.muli %arg0, %c8_i32 : i32
    %c1_i32 = arith.constant 1 : i32
    %c0_i32 = arith.constant 0 : i32
    %1 = arith.cmpi eq, %c1_i32, %c0_i32 : i32
    %c1_i32_0 = arith.constant 1 : i32
    %2 = arith.select %1, %c1_i32_0, %c1_i32 : i32
    %3 = arith.remsi %arg0, %2 : i32
    %c0_i32_1 = arith.constant 0 : i32
    %4 = arith.cmpi ne, %3, %c0_i32_1 : i32
    %c0_i32_2 = arith.constant 0 : i32
    %5 = arith.cmpi slt, %3, %c0_i32_2 : i32
    %c0_i32_3 = arith.constant 0 : i32
    %6 = arith.cmpi slt, %2, %c0_i32_3 : i32
    %7 = arith.xori %5, %6 : i1
    %8 = arith.andi %7, %4 : i1
    %9 = arith.addi %3, %2 : i32
    %10 = arith.select %8, %9, %3 : i32
    %c8_i32_4 = arith.constant 8 : i32
    %11 = arith.muli %10, %c8_i32_4 : i32
    %12 = tpu.assume_multiple %11, 8 : i32
    %c0_i32_5 = arith.constant 0 : i32
    %13 = arith.addi %0, %c0_i32_5 : i32
    %14 = arith.index_cast %13 : i32 to index
    %15 = memref.load %arg1[%14] : memref<16xi32, #tpu.memory_space<smem>>
    %16 = arith.index_cast %15 : i32 to index
    %c0 = arith.constant 0 : index
    %17 = vector.load %arg2[%16, %c0] : memref<32x32xf32, #tpu.memory_space<vmem>>, vector<1x32xf32>
    %18 = arith.index_cast %c0_i32_5 : i32 to index
    %c0_6 = arith.constant 0 : index
    %19 = vector.load %arg7[%18, %c0_6] : memref<8x32xf32, #tpu.memory_space<vmem>>, vector<1x32xf32>
    tpu.vector_store %arg7[%18, %c0_6], %17 {strides = array<i32>} : memref<8x32xf32, #tpu.memory_space<vmem>>, vector<1x32xf32>,
    %c1_i32_7 = arith.constant 1 : i32
    %20 = arith.addi %0, %c1_i32_7 : i32
    %21 = arith.index_cast %20 : i32 to index
    %22 = memref.load %arg1[%21] : memref<16xi32, #tpu.memory_space<smem>>
    %23 = arith.index_cast %22 : i32 to index
    %c0_8 = arith.constant 0 : index
    %24 = vector.load %arg2[%23, %c0_8] : memref<32x32xf32, #tpu.memory_space<vmem>>, vector<1x32xf32>
    %25 = arith.index_cast %c1_i32_7 : i32 to index
    %c0_9 = arith.constant 0 : index
    %26 = vector.load %arg7[%25, %c0_9] : memref<8x32xf32, #tpu.memory_space<vmem>>, vector<1x32xf32>
    tpu.vector_store %arg7[%25, %c0_9], %24 {strides = array<i32>} : memref<8x32xf32, #tpu.memory_space<vmem>>, vector<1x32xf32>,
    %c2_i32 = arith.constant 2 : i32
    %27 = arith.addi %0, %c2_i32 : i32
    %28 = arith.index_cast %27 : i32 to index
    %29 = memref.load %arg1[%28] : memref<16xi32, #tpu.memory_space<smem>>
    %30 = arith.index_cast %29 : i32 to index
    %c0_10 = arith.constant 0 : index
    %31 = vector.load %arg2[%30, %c0_10] : memref<32x32xf32, #tpu.memory_space<vmem>>, vector<1x32xf32>
    %32 = arith.index_cast %c2_i32 : i32 to index
    %c0_11 = arith.constant 0 : index
    %33 = vector.load %arg7[%32, %c0_11] : memref<8x32xf32, #tpu.memory_space<vmem>>, vector<1x32xf32>
    tpu.vector_store %arg7[%32, %c0_11], %31 {strides = array<i32>} : memref<8x32xf32, #tpu.memory_space<vmem>>, vector<1x32xf32>,
    %c3_i32 = arith.constant 3 : i32
    %34 = arith.addi %0, %c3_i32 : i32
    %35 = arith.index_cast %34 : i32 to index
    %36 = memref.load %arg1[%35] : memref<16xi32, #tpu.memory_space<smem>>
    %37 = arith.index_cast %36 : i32 to index
    %c0_12 = arith.constant 0 : index
    %38 = vector.load %arg2[%37, %c0_12] : memref<32x32xf32, #tpu.memory_space<vmem>>, vector<1x32xf32>
    %39 = arith.index_cast %c3_i32 : i32 to index
    %c0_13 = arith.constant 0 : index
    %40 = vector.load %arg7[%39, %c0_13] : memref<8x32xf32, #tpu.memory_space<vmem>>, vector<1x32xf32>
    tpu.vector_store %arg7[%39, %c0_13], %38 {strides = array<i32>} : memref<8x32xf32, #tpu.memory_space<vmem>>, vector<1x32xf32>,
    %c4_i32 = arith.constant 4 : i32
    %41 = arith.addi %0, %c4_i32 : i32
    %42 = arith.index_cast %41 : i32 to index
    %43 = memref.load %arg1[%42] : memref<16xi32, #tpu.memory_space<smem>>
    %44 = arith.index_cast %43 : i32 to index
    %c0_14 = arith.constant 0 : index
    %45 = vector.load %arg2[%44, %c0_14] : memref<32x32xf32, #tpu.memory_space<vmem>>, vector<1x32xf32>
    %46 = arith.index_cast %c4_i32 : i32 to index
    %c0_15 = arith.constant 0 : index
    %47 = vector.load %arg7[%46, %c0_15] : memref<8x32xf32, #tpu.memory_space<vmem>>, vector<1x32xf32>
    tpu.vector_store %arg7[%46, %c0_15], %45 {strides = array<i32>} : memref<8x32xf32, #tpu.memory_space<vmem>>, vector<1x32xf32>,
    %c5_i32 = arith.constant 5 : i32
    %48 = arith.addi %0, %c5_i32 : i32
    %49 = arith.index_cast %48 : i32 to index
    %50 = memref.load %arg1[%49] : memref<16xi32, #tpu.memory_space<smem>>
    %51 = arith.index_cast %50 : i32 to index
    %c0_16 = arith.constant 0 : index
    %52 = vector.load %arg2[%51, %c0_16] : memref<32x32xf32, #tpu.memory_space<vmem>>, vector<1x32xf32>
    %53 = arith.index_cast %c5_i32 : i32 to index
    %c0_17 = arith.constant 0 : index
    %54 = vector.load %arg7[%53, %c0_17] : memref<8x32xf32, #tpu.memory_space<vmem>>, vector<1x32xf32>
    tpu.vector_store %arg7[%53, %c0_17], %52 {strides = array<i32>} : memref<8x32xf32, #tpu.memory_space<vmem>>, vector<1x32xf32>,
    %c6_i32 = arith.constant 6 : i32
    %55 = arith.addi %0, %c6_i32 : i32
    %56 = arith.index_cast %55 : i32 to index
    %57 = memref.load %arg1[%56] : memref<16xi32, #tpu.memory_space<smem>>
    %58 = arith.index_cast %57 : i32 to index
    %c0_18 = arith.constant 0 : index
    %59 = vector.load %arg2[%58, %c0_18] : memref<32x32xf32, #tpu.memory_space<vmem>>, vector<1x32xf32>
    %60 = arith.index_cast %c6_i32 : i32 to index
    %c0_19 = arith.constant 0 : index
    %61 = vector.load %arg7[%60, %c0_19] : memref<8x32xf32, #tpu.memory_space<vmem>>, vector<1x32xf32>
    tpu.vector_store %arg7[%60, %c0_19], %59 {strides = array<i32>} : memref<8x32xf32, #tpu.memory_space<vmem>>, vector<1x32xf32>,
    %c7_i32 = arith.constant 7 : i32
    %62 = arith.addi %0, %c7_i32 : i32
    %63 = arith.index_cast %62 : i32 to index
    %64 = memref.load %arg1[%63] : memref<16xi32, #tpu.memory_space<smem>>
    %65 = arith.index_cast %64 : i32 to index
    %c0_20 = arith.constant 0 : index
    %66 = vector.load %arg2[%65, %c0_20] : memref<32x32xf32, #tpu.memory_space<vmem>>, vector<1x32xf32>
    %67 = arith.index_cast %c7_i32 : i32 to index
    %c0_21 = arith.constant 0 : index
    %68 = vector.load %arg7[%67, %c0_21] : memref<8x32xf32, #tpu.memory_space<vmem>>, vector<1x32xf32>
    tpu.vector_store %arg7[%67, %c0_21], %66 {strides = array<i32>} : memref<8x32xf32, #tpu.memory_space<vmem>>, vector<1x32xf32>,
    %c8_i32_22 = arith.constant 8 : i32
    %c0_23 = arith.constant 0 : index
    %c0_24 = arith.constant 0 : index
    %69 = vector.load %arg7[%c0_23, %c0_24] : memref<8x32xf32, #tpu.memory_space<vmem>>, vector<8x32xf32>
    %70 = arith.index_cast %12 : i32 to index
    %c0_25 = arith.constant 0 : index
    %71 = vector.load %arg3[%70, %c0_25] : memref<16x32xf32, #tpu.memory_space<vmem>>, vector<8x32xf32>
    %72 = arith.addf %69, %71 : vector<8x32xf32>
    %cst = arith.constant dense<0.000000e+00> : vector<8xf32>
    %73 = vector.multi_reduction <add>, %72, %cst [1] : vector<8x32xf32> to vector<8xf32>
    %74 = vector.shape_cast %73 : vector<8xf32> to vector<8x1xf32>
    %75 = arith.mulf %72, %72 : vector<8x32xf32>
    %cst_26 = arith.constant dense<0.000000e+00> : vector<8xf32>
    %76 = vector.multi_reduction <add>, %75, %cst_26 [1] : vector<8x32xf32> to vector<8xf32>
    %77 = vector.shape_cast %76 : vector<8xf32> to vector<8x1xf32>
    %cst_27 = arith.constant 3.125000e-02 : f32
    %78 = vector.broadcast %cst_27 : f32 to vector<8x1xf32>
    %79 = arith.mulf %74, %78 : vector<8x1xf32>
    %cst_28 = arith.constant 3.125000e-02 : f32
    %80 = vector.broadcast %cst_28 : f32 to vector<8x1xf32>
    %81 = arith.mulf %77, %80 : vector<8x1xf32>
    %82 = arith.mulf %79, %79 : vector<8x1xf32>
    %83 = arith.subf %81, %82 : vector<8x1xf32>
    %cst_29 = arith.constant 0.000000e+00 : f32
    %84 = vector.broadcast %cst_29 : f32 to vector<8x1xf32>
    %85 = arith.maximumf %83, %84 : vector<8x1xf32>
    %86 = vector.broadcast %79 : vector<8x1xf32> to vector<8x32xf32>
    %87 = arith.subf %72, %86 : vector<8x32xf32>
    %cst_30 = arith.constant 9.99999974E-6 : f32
    %88 = vector.broadcast %cst_30 : f32 to vector<8x1xf32>
    %89 = arith.addf %85, %88 : vector<8x1xf32>
    %90 = math.rsqrt %89 : vector<8x1xf32>
    %91 = vector.broadcast %90 : vector<8x1xf32> to vector<8x32xf32>
    %92 = arith.mulf %87, %91 : vector<8x32xf32>
    %c0_31 = arith.constant 0 : index
    %c0_32 = arith.constant 0 : index
    %93 = vector.load %arg4[%c0_31, %c0_32] : memref<1x32xf32, #tpu.memory_space<vmem>>, vector<1x32xf32>
    %94 = vector.broadcast %93 : vector<1x32xf32> to vector<8x32xf32>
    %95 = arith.mulf %92, %94 : vector<8x32xf32>
    %c0_33 = arith.constant 0 : index
    %c0_34 = arith.constant 0 : index
    %96 = vector.load %arg5[%c0_33, %c0_34] : memref<1x32xf32, #tpu.memory_space<vmem>>, vector<1x32xf32>
    %97 = vector.broadcast %96 : vector<1x32xf32> to vector<8x32xf32>
    %98 = arith.addf %95, %97 : vector<8x32xf32>
    %c0_35 = arith.constant 0 : index
    %c0_36 = arith.constant 0 : index
    %99 = vector.load %arg6[%c0_35, %c0_36] : memref<8x32xf32, #tpu.memory_space<vmem>>, vector<8x32xf32>
    tpu.vector_store %arg6[%c0_35, %c0_36], %98 {strides = array<i32>} : memref<8x32xf32, #tpu.memory_space<vmem>>, vector<8x32xf32>,
    return
  }
  func.func @transform_0(%arg0: i32, %arg1: memref<16xi32, #tpu.memory_space<smem>>) -> (i32, i32) {
    %c0_i32 = arith.constant 0 : i32
    %c0_i32_0 = arith.constant 0 : i32
    %c0_i32_1 = arith.constant 0 : i32
    return %c0_i32, %c0_i32_0 : i32, i32
  }
  func.func @transform_1(%arg0: i32, %arg1: memref<16xi32, #tpu.memory_space<smem>>) -> (i32, i32) {
    %c0_i32 = arith.constant 0 : i32
    %c0_i32_0 = arith.constant 0 : i32
    %c0_i32_1 = arith.constant 0 : i32
    return %c0_i32, %c0_i32_0 : i32, i32
  }
  func.func @transform_2(%arg0: i32, %arg1: memref<16xi32, #tpu.memory_space<smem>>) -> (i32, i32) {
    %c0_i32 = arith.constant 0 : i32
    %c0_i32_0 = arith.constant 0 : i32
    %c0_i32_1 = arith.constant 0 : i32
    return %c0_i32, %c0_i32_0 : i32, i32
  }
  func.func @transform_3(%arg0: i32, %arg1: memref<16xi32, #tpu.memory_space<smem>>) -> (i32, i32) {
    %c0_i32 = arith.constant 0 : i32
    %c0_i32_0 = arith.constant 0 : i32
    %c0_i32_1 = arith.constant 0 : i32
    return %c0_i32, %c0_i32_0 : i32, i32
  }
  func.func @transform_4(%arg0: i32, %arg1: memref<16xi32, #tpu.memory_space<smem>>) -> (i32, i32) {
    %c0_i32 = arith.constant 0 : i32
    %c0_i32_0 = arith.constant 0 : i32
    return %arg0, %c0_i32 : i32, i32
  }
}

</mosaic_0001>

<bundles_post_ra>
// kernel: tpu_custom_call.1
= control target key start
LH: loop header
LB: loop body
LE: loop exit
PB: predicated region body
PF: predicated region fallthrough
CT: control target
= control target key end

     0   :  { %s592_s18 = smov [#allocation4]   ;;  %s772_s0 = inlined_call_operand.hbm [shape: s32[16], index: 0, kind: input, shape index: {}]   ;;  %s773_s1 = inlined_call_operand.hbm [shape: f32[32,32], index: 1, kind: input, shape index: {}]   ;;  %s774_s2 = inlined_call_operand.hbm [shape: f32[16,32], index: 2, kind: input, shape index: {}]   ;;  %s775_s3 = inlined_call_operand.vmem [shape: f32[1,32], index: 3, kind: input, shape index: {}]   ;;  %s776_s4 = inlined_call_operand.vmem [shape: f32[1,32], index: 4, kind: input, shape index: {}]   ;;  %s777_s5 = inlined_call_operand.hbm [shape: f32[16,32], index: 5, kind: output, shape index: {}]  }
   0x1   :  { %779 = sst [smem:[#allocation15_spill]] %s773_s1 }
   0x2   :  { %11 = dma.hbm_to_smem %s772_s0, 16, %s592_s18, [#allocation3] }
   0x3   :  { %562 = dma.done.wait [#allocation3], 16 }
   0x4   :  { %563 = vsyncadd [#allocation3], 4294967280 }
   0x5   :  { %13 = sfence }
   0x6   :  { %14 = vsyncpa [#allocation6], 0 }
   0x7   :  { %15 = vsyncpa [#allocation9], 0 }
   0x8   :  { %16 = vsyncpa [#allocation7], 0 }
   0x9   :  { %18 = vsyncpa [#allocation7 + $0x1], 0  ;;  %s631_s21 = smov 0   ;;  %s633_s22 = smov 0  }
   0xa   :  { %s635_s23 = smov 0   ;;  %s637_s24 = smov 0  }
   0xb LB: > { %s652_s0 = sadd.s32 4294967295, %s590_s24   ;;  %s380_s25 = sadd.s32 4294967294, %s590_s24   ;;  %s590_s24 = sphi %s637_s24, %s793_s24   ;;  %s586_s23 = sphi %s635_s23, %s792_s23   ;;  %s582_s22 = sphi %s633_s22, %s791_s22   ;;  %s578_s21 = sphi %s631_s21, %s790_s21  }
   0xc   : > { %s656_s26 = sadd.s32 1, %s590_s24   ;;  %s115_s27 = sadd.s32 1, %s586_s23 }
   0xd   : > { %s112_s28 = ssub.s32 %s590_s24, %s656_s26  ;;  %p125_p0 = scmp.ne.s32.totalorder %s586_s23, %s582_s22 }
   0xe   : > { %p113_p1 = scmp.eq.s32.totalorder %s112_s28, 0  ;;  %p126_p2 = scmp.eq.s32.totalorder %s652_s0, 1 }
   0xf   : > { %p131_p3 = scmp.ne.s32.totalorder %s582_s22, %s578_s21  ;;  %p132_p4 = scmp.eq.s32.totalorder %s380_s25, 1 }
  0x10   : > { %s667_s29 = scalar_select %p113_p1, %s586_s23, %s115_s27  }
  0x11   : > { %p669_p5 = por %p126_p2, %p125_p0  ;;  %p673_p6 = por %p132_p4, %p131_p3 }
  0x12   : > { %p381_p7 = scmp.ge.s32.totalorder %s590_s24, 1  ;;  %p139_p8 = scmp.lt.s32.totalorder %s590_s24, 3 }
  0x13   : > { %s781_s6 = scalar_select %p673_p6, 1, 0 }
  0x14   : > { %p778_p9 = scmp.eq.s32.totalorder %s652_s0, 0  ;;  %p680_p10 = pnand %p381_p7, %p139_p8 }
  0x15   : > { %s593_s8 = smov [#allocation5]   ;;  %s594_s11 = smov [#allocation8]  }
  0x16   : > { %s151_s9 = sshll.u32 %s593_s8, 4  ;;  %p405_p11 = pneg %p680_p10  ;;  %s152_s9 = int_to_ptr.vmem [resolvable:$true] %s151_s9 }
  0x17   : > { %s164_s12 = sshll.u32 %s594_s11, 4  ;;  %s479_s13 = scalar_lea.vmem %s152_s9, 512  ;;  %s165_s12 = int_to_ptr.vmem [resolvable:$true] %s164_s12 }
  0x18   : > { %p688_p12 = pnand %p778_p9, %p405_p11  ;;  %p480_p0 = scmp.ne.s32.totalorder %s152_s9, %s479_s13 }
  0x19   : > { %p487_p3 = scmp.lt.s32.totalorder %s152_s9, %s152_s9  ;;  %p488_p4 = scmp.lt.s32.totalorder %s479_s13, %s479_s13 }
  0x1a   : > { %p470_p13 = pneg %p688_p12 }
  0x1b   : > { %p489_p7 = por %p488_p4, %p487_p3 }
  0x1c   : > { %p482_p1 = pnand %p480_p0, %p470_p13 }
  0x1e   : > { %p483_p2 = pneg %p482_p1 }
  0x20   : > { %p490_p8 = pnand %p489_p7, %p483_p2 }
  0x22   : > { %493 = shalt.err (!%p490_p8)
}
  0x23   : > { %s595_s14 = smov 128   ;;  %s596_s15 = smov 8  }
  0x24   : > { %s784_s1 = sld [smem:[#allocation15_spill]]  ;;  %s505_s18 = scalar_lea.vmem %s165_s12, 256 }
  0x25   : > { %p506_p11 = scmp.ne.s32.totalorder %s165_s12, %s505_s18  ;;  %p513_p9 = scmp.lt.s32.totalorder %s165_s12, %s165_s12 }
  0x26   : > { %p514_p6 = scmp.lt.s32.totalorder %s505_s18, %s505_s18 }
  0x27   : > { %p508_p0 = pnand %p506_p11, %p470_p13 }
  0x28   : > { %p515_p3 = por %p514_p6, %p513_p9 }
  0x29   : > { %p509_p1 = pneg %p508_p0 }
  0x2a   : > { %408 = dma.hbm_to_vmem [thread:$0]  (!%p688_p12), %s784_s1, 512, %s152_s9, [#allocation6], %s595_s14, %s595_s14, %s596_s15  }
  0x2b   : > { %p516_p2 = pnand %p515_p3, %p509_p1 }
  0x2d   : > { %519 = shalt.err (!%p516_p2)
}
  0x2e   : > { %411 = dma.hbm_to_vmem [thread:$0]  (!%p688_p12), %s774_s2, 256, %s165_s12, [#allocation9], %s595_s14, %s595_s14, %s596_s15  }
  0x2f   : > { %186 = sbr.rel (%p680_p10) target bundleno = 267 (0x10b), region = 36  ;;  %p785_p4 = scmp.eq.s32.totalorder (!%p680_p10), %s652_s0, 0 }
  0x34   : > { %565 = dma.done.wait (%p785_p4), [#allocation6], 512   ;;  %p786_p13 = pmov %p785_p4 }
  0x35   : > { %p787_p7 = pmov %p785_p4 }
  0x36   : > { %567 = vsyncadd (%p786_p13), [#allocation6], 4294966784 }
  0x37   : > { %569 = dma.done.wait (%p787_p7), [#allocation9], 256   ;;  %p788_p6 = pmov %p785_p4 }
  0x38   : > { %s388_s25 = sshll.u32 %s652_s0, 3  ;;  %vm215_vm0 = vcmask 253952   ;;  %v253_v8 = vld [vmem:[#allocation8] sm:$0xff]  ;;  %vm255_vm1 = vcmask 261120   ;;  %v389_v24 = vld [vmem:[%s775_s3] ss:$0 sm:$0xff] }
  0x39   : > { %571 = vsyncadd (%p788_p6), [#allocation9], 4294967040  ;;  %s212_s27 = sld [smem:[#allocation4 + %s388_s25]]  ;;  %s217_s28 = sadd.s32 1, %s388_s25  ;;  %v390_v26 = vld [vmem:[%s776_s4] ss:$0 sm:$0xff] }
  0x3a   : > { %s218_s8 = sld [smem:[#allocation4 + %s217_s28]]  ;;  %s222_s9 = sadd.s32 2, %s388_s25 }
  0x3b   : > { %s223_s7 = sld [smem:[#allocation4 + %s222_s9]]  ;;  %s227_s10 = sadd.s32 3, %s388_s25 }
  0x3c   : > { %s228_s11 = sld [smem:[#allocation4 + %s227_s10]]  ;;  %s232_s12 = sadd.s32 4, %s388_s25 }
  0x3d   : > { %s233_s13 = sld [smem:[#allocation4 + %s232_s12]]  ;;  %s237_s14 = sadd.s32 5, %s388_s25 }
  0x3e   : > { %s238_s15 = sld [smem:[#allocation4 + %s237_s14]]  ;;  %s242_s16 = sadd.s32 6, %s388_s25 }
  0x3f   : > { %s243_s17 = sld [smem:[#allocation4 + %s242_s16]]  ;;  %s213_s18 = scalar_lea.vmem [#allocation5], %s212_s27 }
  0x40   : > { %v214_v0 = vld [vmem:[%s213_s18] sm:$0x1]  ;;  %s247_s19 = sadd.s32 7, %s388_s25  ;;  %s219_s20 = scalar_lea.vmem [#allocation5], %s218_s8 }
  0x41   : > { %216 = vst.msk [vmem:[#allocation2] sm:$0x1] %vm215_vm0, %v214_v0  ;;  %v220_v1 = vld [vmem:[%s219_s20] sm:$0x1]  ;;  %s248_s1 = sld [smem:[#allocation4 + %s247_s19]]  ;;  %s224_s28 = scalar_lea.vmem [#allocation5], %s223_s7 }
  0x42   : > { %221 = vst.msk [vmem:[#allocation2 + $0x1] sm:$0x1] %vm215_vm0, %v220_v1  ;;  %v225_v2 = vld [vmem:[%s224_s28] sm:$0x1]  ;;  %s229_s9 = scalar_lea.vmem [#allocation5], %s228_s11 }
  0x43   : > { %226 = vst.msk [vmem:[#allocation2 + $0x2] sm:$0x1] %vm215_vm0, %v225_v2  ;;  %v230_v3 = vld [vmem:[%s229_s9] sm:$0x1]  ;;  %s234_s10 = scalar_lea.vmem [#allocation5], %s233_s13 }
  0x44   : > { %231 = vst.msk [vmem:[#allocation2 + $0x3] sm:$0x1] %vm215_vm0, %v230_v3  ;;  %v235_v4 = vld [vmem:[%s234_s10] sm:$0x1]  ;;  %s239_s25 = scalar_lea.vmem [#allocation5], %s238_s15  ;;  %s392_s15 = sshll.u32 %s652_s0, 7 }
  0x45   : > { %236 = vst.msk [vmem:[#allocation2 + $0x4] sm:$0x1] %vm215_vm0, %v235_v4  ;;  %v240_v5 = vld [vmem:[%s239_s25] sm:$0x1]  ;;  %s244_s27 = scalar_lea.vmem [#allocation5], %s243_s17  ;;  %s301_s20 = scalar_lea.hbm %s777_s5, %s392_s15 }
  0x46   : > { %241 = vst.msk [vmem:[#allocation2 + $0x5] sm:$0x1] %vm215_vm0, %v240_v5  ;;  %v245_v6 = vld [vmem:[%s244_s27] sm:$0x1]  ;;  %s597_s10 = smov [#allocation10]  }
  0x47   : > { %246 = vst.msk [vmem:[#allocation2 + $0x6] sm:$0x1] %vm215_vm0, %v245_v6  ;;  %s249_s8 = scalar_lea.vmem [#allocation5], %s248_s1  ;;  %s208_s1 = sand.u32 1, %s582_s22  }
  0x48   : > { %v250_v7 = vld [vmem:[%s249_s8] sm:$0x1]  ;;  %s387_s7 = sshll.u32 %s208_s1, 3  ;;  %s290_s28 = scalar_lea.sflag [#allocation7], %s208_s1 }
  0x49   : > { %251 = vst.msk [vmem:[#allocation2 + $0x7] sm:$0x1] %vm215_vm0, %v250_v7  ;;  %s210_s16 = scalar_lea.vmem [#allocation10], %s387_s7  ;;  %s524_s25 = sshll.u32 %s597_s10, 4  ;;  %s525_s25 = int_to_ptr.vmem [resolvable:$false] %s524_s25 }
  0x4a   : > { %s303_s17 = sshll.u32 %s210_s16, 4  ;;  %s526_s0 = scalar_lea.vmem %s525_s25, 256  ;;  %s304_s17 = int_to_ptr.vmem [resolvable:$true] %s303_s17 }
  0x4b   : > { %s520_s9 = scalar_lea.vmem %s304_s17, 128  ;;  %p527_p8 = scmp.lt.s32.totalorder %s304_s17, %s525_s25 }
  0x4c   : > { %p521_p9 = scmp.ne.s32.totalorder %s304_s17, %s520_s9  ;;  %p528_p11 = scmp.lt.s32.totalorder %s526_s0, %s520_s9 }
  0x4e   : > { %p522_p10 = pnand %p521_p9, %p669_p5  ;;  %p529_p0 = por %p528_p11, %p527_p8 }
  0x50   : > { %v252_v9 = vld [vmem:[#allocation2] sm:$0xff]  ;;  %p523_p12 = pneg %p522_p10 }
  0x51   : > { %v254_v10 = vadd.f32 %v253_v8, %v252_v9 }
  0x52   : > { %p530_p1 = pnand %p529_p0, %p523_p12 }
  0x53   : > { %v256_v11 = vsel %vm255_vm1, %v254_v10, 0.0  ;;  %v259_v12 = vmul.f32 %v254_v10, %v254_v10 }
  0x54   : > { %257 = vadd.xlane.f32.xlu0 %v256_v11 }
  0x55   : > { %v260_v13 = vsel %vm255_vm1, %v259_v12, 0.0 }
  0x58   : > { %261 = vadd.xlane.f32.xlu0 %v260_v13 }
  0xdd   : > { %v258_v14 = vpop.xlane.xlu0 %257 }
  0xde   : > { %v263_v15 = vmul.f32 0.03125, %v258_v14 }
  0xe0   : > { %v265_v17 = vmul.f32 %v263_v15, %v263_v15  ;;  %v268_v22 = vsub.f32 %v254_v10, %v263_v15 }
  0xe1   : > { %v262_v16 = vpop.xlane.xlu0 %261 }
  0xe2   : > { %v264_v18 = vmul.f32 0.03125, %v262_v16 }
  0xe4   : > { %v266_v19 = vsub.f32 %v264_v18, %v265_v17 }
  0xe6   : > { %v267_v20 = vmax.f32 %v266_v19, 0.0 }
  0xe8   : > { %v269_v21 = vadd.f32 1e-05, %v267_v20 }
  0xea   : > { %458 = vrsqrt.f32 %v269_v21 }
  0xf7   : > { %v459_v23 = vpop.eup %458 }
  0xf8   : > { %v271_v25 = vmul.f32 %v459_v23, %v268_v22 }
  0xfa   : > { %v279_v27 = vmul.f32 %v389_v24, %v271_v25 }
  0xfc   : > { %v287_v28 = vadd.f32 %v390_v26, %v279_v27 }
  0xfe   : > { %288 = vst.msk [vmem:[%s210_s16] sm:$0xff] %vm255_vm1, %v287_v28 }
  0xff   : > { %533 = shalt.err (!%p530_p1)
}
 0x100   : > { %s534_s27 = scalar_lea.hbm %s301_s20, 128  ;;  %s538_s7 = scalar_lea.hbm %s777_s5, 256 }
 0x101   : > { %p535_p3 = scmp.ne.s32.totalorder %s301_s20, %s534_s27  ;;  %p539_p13 = scmp.lt.s32.totalorder %s301_s20, %s777_s5 }
 0x102   : > { %p540_p7 = scmp.lt.s32.totalorder %s538_s7, %s534_s27 }
 0x103   : > { %p536_p2 = pnand %p535_p3, %p669_p5 }
 0x104   : > { %p541_p6 = por %p540_p7, %p539_p13 }
 0x105   : > { %p537_p4 = pneg %p536_p2 }
 0x107   : > { %p542_p9 = pnand %p541_p6, %p537_p4 }
 0x109   : > { %545 = shalt.err (!%p542_p9)
}
 0x10a   : > { %403 = dma.vmem_to_hbm [thread:$0]  (%p669_p5), %s304_s17, 128, %s301_s20, %s290_s28  }
 0x10b PF: > { %p420_p10 = scmp.ge.s32.totalorder %s590_s24, 2  ;;  %s315_s13 = sand.u32 1, %s578_s21  }
 0x10c   : > { %p789_p12 = scmp.ne.s32.totalorder %s781_s6, 0  ;;  %s316_s14 = scalar_lea.sflag [#allocation7], %s315_s13 }
 0x10e   : > { %p413_p8 = pnand %p420_p10, %p789_p12 }
 0x110   : > { %p414_p11 = pneg %p413_p8 }
 0x112   : > { %573 = dma.done.wait (%p414_p11), %s316_s14, 128  }
 0x113   : > { %575 = vsyncadd (%p414_p11), %s316_s14, 4294967168  ;;  %p21_p0 = scmp.ge.s32.totalorder %s656_s26, 4   ;;  %s790_s21 = smov %s582_s22 }
 0x114   : > { %s791_s22 = smov %s586_s23  ;;  %s792_s23 = smov %s667_s29 }
 0x115   : > { %s793_s24 = smov %s656_s26  ;;  %23 = sbr.rel (!%p21_p0) target bundleno = 11 (0xb), region = 85 }
 0x11a   :  { %321 = vsyncpa [#allocation6], 1 }
 0x11b   :  { %323 = vsyncpa [#allocation6 + $0x1], 1 }
 0x11c   :  { %324 = vsyncpa [#allocation9], 1 }
 0x11d   :  { %325 = vsyncpa [#allocation7], 1 }
 0x11e   :  { %327 = vsyncpa [#allocation7 + $0x1], 1 }

</bundles_post_ra>
